<compile_context>
chip_gen: v5e
topology: v5e:2x2
jax: 0.10.0
libtpu: 0.0.40
codegen_flags: <defaults>
</compile_context>

<pallas_src>
import functools

import jax
import jax.numpy as jnp
import numpy as np
from jax.experimental import pallas as pl
from jax.experimental.pallas import tpu as pltpu


# ----------------------------- configuration -------------------------------
BATCH = 2
NUM_PARTICLES = 8
FEATURES = 4                       # (E, px, py, pz)
LATENT_DIM = 32
PFN_MAP_HIDDEN = [32, 32]          # Phi hidden layers
PFN_CLS_HIDDEN = [32]              # F hidden layers
LI_HIDDEN = [16, 16]               # Lorentz-invariant MLP hidden layers
INVARIANT_WEIGHT = 0.3             # must be in [0, 1]

TILE_EVENTS_DEFAULT = 1024         # events per grid step


def _round_up(n, m):
    return ((n + m - 1) // m) * m


def _mlp_dims(in_dim, hidden, out_dim):
    dims = [in_dim] + list(hidden) + [out_dim]
    return list(zip(dims[:-1], dims[1:]))


PHI_DIMS = _mlp_dims(FEATURES, PFN_MAP_HIDDEN, LATENT_DIM)   # Phi: 4 -> ... -> latent
F_DIMS = _mlp_dims(LATENT_DIM, PFN_CLS_HIDDEN, 1)            # F:   latent -> ... -> 1
LI_DIMS = _mlp_dims(1, LI_HIDDEN, 1)                         # LI:  1 -> ... -> 1


# ------------------------------- kernel ------------------------------------
def _dense(h, layer, w_ref, b_ref, relu):
    """One layer read out of the packed weight/bias slabs.

    layer = (kind, w_row_offset, rows, cols, bias_row) — all static Python ints.
      kind == "mat" : (rows, cols) weight block, MXU matmul.
      kind == "in1" : input dim 1, weight stored as a (1, cols) row -> VPU broadcast.
      kind == "out1": output dim 1, weight stored transposed as (1, cols) -> lane reduce.
    bias_row == -1 means no bias (selection matrices).
    """
    kind, off, rows, cols, bidx = layer
    if kind == "mat":
        w = w_ref[off:off + rows, 0:cols]                      # (rows, cols)
        y = jnp.dot(h, w, preferred_element_type=jnp.float32)  # MXU
        dout = cols
    elif kind == "in1":
        w = w_ref[off:off + 1, 0:cols]                         # (1, cols)
        y = h * w                                              # (tm,1)*(1,cols) on VPU
        dout = cols
    else:  # "out1"
        w = w_ref[off:off + 1, 0:cols]                         # (1, cols) == W.T
        y = jnp.sum(h * w, axis=-1, keepdims=True)             # VPU mul + lane reduce
        dout = 1
    if bidx >= 0:
        y = y + b_ref[bidx:bidx + 1, 0:dout]
    if relu:
        y = jnp.maximum(y, 0.0)
    return y


def _hybrid_kernel(x_ref, w_ref, b_ref, out_ref, *,
                   phi_layers, f_layers, li_layers, sel_layers, w_inv):
    """All compute lives here.

    x_ref  : (tm, P*F) f32 tile — one event per row, lane-dense features.
    w_ref  : packed weight slab (resident across the grid).
    b_ref  : packed bias slab   (resident across the grid).
    out_ref: (tm, 1) f32 tile of combined classifier outputs.
    """
    x = x_ref[...]                                             # (tm, P*F)

    # --- PFN: block-diagonal Phi (per-particle MLP for all P particles at once) ---
    h = x
    for layer in phi_layers:
        h = _dense(h, layer, w_ref, b_ref, relu=True)          # (tm, P*latent)

    # --- PFN classifier F; layer 1 fuses the (linear) particle sum ---
    g = h
    n_f = len(f_layers)
    for i, layer in enumerate(f_layers):
        g = _dense(g, layer, w_ref, b_ref, relu=(i < n_f - 1))
    general = 1.0 / (1.0 + jnp.exp(-g))                        # (tm, 1)

    # --- Lorentz-invariant branch ---
    sel_plain, sel_metric = sel_layers
    tot = _dense(x, sel_plain, w_ref, b_ref, relu=False)       # (tm, 4)  sum_p p4
    totm = _dense(x, sel_metric, w_ref, b_ref, relu=False)     # (tm, 4)  metric-signed
    m2 = jnp.sum(tot * totm, axis=-1, keepdims=True)           # (tm, 1)  Minkowski norm

    z = m2
    n_li = len(li_layers)
    for i, layer in enumerate(li_layers):
        z = _dense(z, layer, w_ref, b_ref, relu=(i < n_li - 1))
    invariant = 1.0 / (1.0 + jnp.exp(-z))                      # (tm, 1)

    out_ref[...] = ((1.0 - w_inv) * general
                    + w_inv * invariant).astype(out_ref.dtype)


# --------------------------- parameter packing ------------------------------
def _block_diag(w, n):
    """(din, dout) -> (n*din, n*dout) block diagonal of n copies of w."""
    din, dout = w.shape
    out = np.zeros((n * din, n * dout), np.float32)
    for i in range(n):
        out[i * din:(i + 1) * din, i * dout:(i + 1) * dout] = w
    return out


def _small_layer(w, b):
    """Layout for a small (non block-diag) layer; dout==1 stored transposed."""
    w = np.asarray(w, np.float32)
    b = np.asarray(b, np.float32).reshape(1, -1)
    din, dout = w.shape
    if din == 1:
        return ("in1", w, b)
    if dout == 1:
        return ("out1", np.ascontiguousarray(w.T), b)
    return ("mat", w, b)


def _pack_params(params, *, num_particles, features):
    """Pack all weights/biases into two lane-padded f32 slabs + static metadata.

    Phi layers become (P*din, P*dout) block-diagonals; F's first layer becomes
    vstack([Wf1]*P) so the per-event particle sum is fused into the matmul
    (exact: the sum is linear, between Phi's last ReLU and F's first linear).
    Two constant (P*F, F) selection matrices (plain / Minkowski-signed) give
    the summed event 4-momentum for the Lorentz branch.
    """
    P, F = num_particles, features

    def npw(a):
        return np.asarray(a, np.float32)

    def npb(a):
        return np.asarray(a, np.float32).reshape(1, -1)

    entries = []   # (group, kind, weight_2d, bias_row_or_None)

    # Phi: block-diagonalized per-particle MLP (ReLU on every layer).
    for (w, b) in params["phi"]:
        entries.append(("phi", "mat",
                        _block_diag(npw(w), P), np.tile(npb(b), (1, P))))

    # F classifier: first layer fused with the particle sum.
    f_list = [(npw(w), npb(b)) for (w, b) in params["f"]]
    wf1, bf1 = f_list[0]
    entries.append(("f", "mat", np.tile(wf1, (P, 1)), bf1))     # (P*latent, cls0)
    for (w, b) in f_list[1:]:
        entries.append(("f",) + _small_layer(w, b))

    # Lorentz-invariant MLP.
    for (w, b) in params["li"]:
        entries.append(("li",) + _small_layer(npw(w), npb(b)))

    # Constant selection matrices: x (tm, P*F) -> summed 4-momentum (tm, F).
    sel = np.zeros((P * F, F), np.float32)
    selm = np.zeros((P * F, F), np.float32)
    metric = np.array([1.0] + [-1.0] * (F - 1), np.float32)
    for p in range(P):
        for c in range(F):
            sel[p * F + c, c] = 1.0
            selm[p * F + c, c] = metric[c]
    entries.append(("sel", "mat", sel, None))
    entries.append(("sel", "mat", selm, None))

    # Assign 8-aligned row offsets; build the slabs once with numpy.
    lanes = _round_up(max(e[2].shape[1] for e in entries), 128)
    metas = {"phi": [], "f": [], "li": [], "sel": []}
    row, brow = 0, 0
    w_parts, b_parts = [], []
    for (group, kind, w2d, b_row) in entries:
        off = row
        w_parts.append((off, w2d))
        row += _round_up(w2d.shape[0], 8)
        bidx = -1
        if b_row is not None:
            bidx = brow
            b_parts.append((brow, b_row))
            brow += 1
        metas[group].append((kind, off, int(w2d.shape[0]), int(w2d.shape[1]), bidx))

    w_slab = np.zeros((_round_up(max(row, 8), 8), lanes), np.float32)
    for off, w2d in w_parts:
        w_slab[off:off + w2d.shape[0], :w2d.shape[1]] = w2d
    b_slab = np.zeros((_round_up(max(brow, 1), 8), lanes), np.float32)
    for r, b_row in b_parts:
        b_slab[r, :b_row.shape[1]] = b_row[0]

    return (jnp.asarray(w_slab), jnp.asarray(b_slab),
            tuple(metas["phi"]), tuple(metas["f"]),
            tuple(metas["li"]), tuple(metas["sel"]))


# ------------------------------- wrapper ------------------------------------
def weighted_hybrid_forward(x, params, *, invariant_weight,
                            tile_events=TILE_EVENTS_DEFAULT):
    """x: (B, P, 4) float32. params: dict with 'phi', 'f', 'li' layer lists."""
    if invariant_weight > 1 or invariant_weight < 0:
        raise ValueError("Classifier weights must be between 0 and 1.")

    B, P, F = x.shape
    w_slab, b_slab, phi_m, f_m, li_m, sel_m = _pack_params(
        params, num_particles=P, features=F)

    PF = P * F
    x2d = x.reshape(B, PF)                 # event rows, lane-dense P*F features

    # Pad only to a sublane multiple (<= 7 rows).  Any raggedness of the last
    # grid tile is handled by Pallas boundary masking (no full-array copy).
    Bp = _round_up(B, 8)
    if Bp != B:
        x2d = jnp.concatenate(
            [x2d, jnp.zeros((Bp - B, PF), x2d.dtype)], axis=0)

    # Tile the batch.  Aim for >= 2 tiles when the batch is large enough so a
    # v7x megacore (2 TensorCores) gets parallel work on the grid axis.
    tm = min(int(tile_events), max(8, _round_up(pl.cdiv(Bp, 2), 8)))
    tm = _round_up(min(max(tm, 8), Bp), 8)
    n_tiles = pl.cdiv(Bp, tm)

    kernel = functools.partial(
        _hybrid_kernel,
        phi_layers=phi_m, f_layers=f_m, li_layers=li_m, sel_layers=sel_m,
        w_inv=float(invariant_weight))

    out = pl.pallas_call(
        kernel,
        out_shape=jax.ShapeDtypeStruct((Bp, 1), jnp.float32),
        grid=(n_tiles,),
        in_specs=[
            pl.BlockSpec((tm, PF), lambda i: (i, 0)),       # x tile, double-buffered
            pl.BlockSpec(w_slab.shape, lambda i: (0, 0)),   # weight slab, resident
            pl.BlockSpec(b_slab.shape, lambda i: (0, 0)),   # bias slab, resident
        ],
        out_specs=pl.BlockSpec((tm, 1), lambda i: (i, 0)),
        compiler_params=pltpu.CompilerParams(
            dimension_semantics=("parallel",)),             # v7x: 2 TCs share tiles
    )(x2d, w_slab, b_slab)
    return out[:B]


# ------------------------ deterministic param init --------------------------
def _init_mlp(key, dims):
    layers = []
    for (din, dout) in dims:
        key, kw, kb = jax.random.split(key, 3)
        scale = 1.0 / np.sqrt(din)
        w = jax.random.uniform(kw, (din, dout), jnp.float32, -scale, scale)
        b = jax.random.uniform(kb, (1, dout), jnp.float32, -scale, scale)
        layers.append((w, b))
    return key, layers


def init_params(seed=0):
    key = jax.random.PRNGKey(seed)
    key, phi = _init_mlp(key, PHI_DIMS)
    key, f = _init_mlp(key, F_DIMS)
    key, li = _init_mlp(key, LI_DIMS)
    return {"phi": phi, "f": f, "li": li}


# --------------------------- pure-JAX reference ------------------------------
def reference_forward(x, params, *, invariant_weight):
    B, P, F = x.shape
    h = x.reshape(B * P, F)
    for w, b in params["phi"]:
        h = jnp.maximum(h @ w + b, 0.0)
    latent = h.reshape(B, P, -1).sum(axis=1)
    g = latent
    for i, (w, b) in enumerate(params["f"]):
        g = g @ w + b
        if i < len(params["f"]) - 1:
            g = jnp.maximum(g, 0.0)
    general = 1.0 / (1.0 + jnp.exp(-g))

    tot = x.sum(axis=1)                                        # (B, 4)
    m2 = tot[:, :1] ** 2 - (tot[:, 1:] ** 2).sum(axis=-1, keepdims=True)
    z = m2
    for i, (w, b) in enumerate(params["li"]):
        z = z @ w + b
        if i < len(params["li"]) - 1:
            z = jnp.maximum(z, 0.0)
    invariant = 1.0 / (1.0 + jnp.exp(-z))
    return (1.0 - invariant_weight) * general + invariant_weight * invariant


# ---------------------------------- main -------------------------------------
if __name__ == "__main__":
    params = init_params(seed=0)

    # Small demo shape consistent with the module (B=2 events, 8 particles, 4 features).
    x_small = jax.random.normal(jax.random.PRNGKey(0),
                                (BATCH, NUM_PARTICLES, FEATURES), jnp.float32)
    out = jax.block_until_ready(
        weighted_hybrid_forward(x_small, params, invariant_weight=INVARIANT_WEIGHT))
    ref = reference_forward(x_small, params, invariant_weight=INVARIANT_WEIGHT)
    np.testing.assert_allclose(np.asarray(out), np.asarray(ref), rtol=1e-5, atol=1e-5)

    # Exercise the multi-tile path: 640 events, 256-event tiles -> grid=3
    # (last tile ragged, handled by Pallas boundary masking).
    x_big = jax.random.normal(jax.random.PRNGKey(1),
                              (640, NUM_PARTICLES, FEATURES), jnp.float32)
    out_big = jax.block_until_ready(
        weighted_hybrid_forward(x_big, params, invariant_weight=INVARIANT_WEIGHT,
                                tile_events=256))
    ref_big = reference_forward(x_big, params, invariant_weight=INVARIANT_WEIGHT)
    np.testing.assert_allclose(np.asarray(out_big), np.asarray(ref_big),
                               rtol=1e-5, atol=1e-5)

    print("KERNEL_OK")
</pallas_src>

<mosaic_0001>
module attributes {stable_mosaic.version = 11 : i64} {
  func.func @_hybrid_kernel(%arg0: i32, %arg1: memref<8x32xf32, #tpu.memory_space<vmem>>, %arg2: memref<904x256xf32, #tpu.memory_space<vmem>>, %arg3: memref<8x256xf32, #tpu.memory_space<vmem>>, %arg4: memref<8x1xf32, #tpu.memory_space<vmem>>) attributes {dimension_semantics = [#tpu.dimension_semantics<parallel>], iteration_bounds = array<i64: 1>, scalar_prefetch = 0 : i64, scratch_operands = 0 : i64, tpu.core_type = #tpu.core_type<tc>, window_params = [{transform_indices = @transform_0, window_bounds = array<i64: 8, 32>}, {pipeline_mode = #tpu.pipeline_mode<synchronous>, transform_indices = @transform_1, window_bounds = array<i64: 904, 256>}, {pipeline_mode = #tpu.pipeline_mode<synchronous>, transform_indices = @transform_2, window_bounds = array<i64: 8, 256>}, {transform_indices = @transform_3, window_bounds = array<i64: 8, 1>}]} {
    %c0 = arith.constant 0 : index
    %c0_0 = arith.constant 0 : index
    %0 = vector.load %arg1[%c0, %c0_0] : memref<8x32xf32, #tpu.memory_space<vmem>>, vector<8x32xf32>
    %c0_1 = arith.constant 0 : index
    %c0_2 = arith.constant 0 : index
    %1 = vector.load %arg2[%c0_1, %c0_2] : memref<904x256xf32, #tpu.memory_space<vmem>>, vector<32x256xf32>
    %cst = arith.constant dense<0.000000e+00> : vector<8x256xf32>
    %2 = tpu.matmul %0, %1, %cst {dimension_numbers = #tpu.dot_dimension_numbers<[1], [0], [0], [1], [0, 0, 1, 1], [], []>} : vector<8x32xf32>, vector<32x256xf32>, vector<8x256xf32> -> vector<8x256xf32>
    %c0_3 = arith.constant 0 : index
    %c0_4 = arith.constant 0 : index
    %3 = vector.load %arg3[%c0_3, %c0_4] : memref<8x256xf32, #tpu.memory_space<vmem>>, vector<1x256xf32>
    %4 = vector.broadcast %3 : vector<1x256xf32> to vector<8x256xf32>
    %5 = arith.addf %2, %4 : vector<8x256xf32>
    %cst_5 = arith.constant 0.000000e+00 : f32
    %6 = vector.broadcast %cst_5 : f32 to vector<8x256xf32>
    %7 = arith.maximumf %5, %6 : vector<8x256xf32>
    %c32 = arith.constant 32 : index
    %c0_6 = arith.constant 0 : index
    %8 = vector.load %arg2[%c32, %c0_6] : memref<904x256xf32, #tpu.memory_space<vmem>>, vector<256x256xf32>
    %cst_7 = arith.constant dense<0.000000e+00> : vector<8x256xf32>
    %9 = tpu.matmul %7, %8, %cst_7 {dimension_numbers = #tpu.dot_dimension_numbers<[1], [0], [0], [1], [0, 0, 1, 1], [], []>} : vector<8x256xf32>, vector<256x256xf32>, vector<8x256xf32> -> vector<8x256xf32>
    %c1 = arith.constant 1 : index
    %c0_8 = arith.constant 0 : index
    %10 = vector.load %arg3[%c1, %c0_8] : memref<8x256xf32, #tpu.memory_space<vmem>>, vector<1x256xf32>
    %11 = vector.broadcast %10 : vector<1x256xf32> to vector<8x256xf32>
    %12 = arith.addf %9, %11 : vector<8x256xf32>
    %cst_9 = arith.constant 0.000000e+00 : f32
    %13 = vector.broadcast %cst_9 : f32 to vector<8x256xf32>
    %14 = arith.maximumf %12, %13 : vector<8x256xf32>
    %c288 = arith.constant 288 : index
    %c0_10 = arith.constant 0 : index
    %15 = vector.load %arg2[%c288, %c0_10] : memref<904x256xf32, #tpu.memory_space<vmem>>, vector<256x256xf32>
    %cst_11 = arith.constant dense<0.000000e+00> : vector<8x256xf32>
    %16 = tpu.matmul %14, %15, %cst_11 {dimension_numbers = #tpu.dot_dimension_numbers<[1], [0], [0], [1], [0, 0, 1, 1], [], []>} : vector<8x256xf32>, vector<256x256xf32>, vector<8x256xf32> -> vector<8x256xf32>
    %c2 = arith.constant 2 : index
    %c0_12 = arith.constant 0 : index
    %17 = vector.load %arg3[%c2, %c0_12] : memref<8x256xf32, #tpu.memory_space<vmem>>, vector<1x256xf32>
    %18 = vector.broadcast %17 : vector<1x256xf32> to vector<8x256xf32>
    %19 = arith.addf %16, %18 : vector<8x256xf32>
    %cst_13 = arith.constant 0.000000e+00 : f32
    %20 = vector.broadcast %cst_13 : f32 to vector<8x256xf32>
    %21 = arith.maximumf %19, %20 : vector<8x256xf32>
    %c544 = arith.constant 544 : index
    %c0_14 = arith.constant 0 : index
    %22 = vector.load %arg2[%c544, %c0_14] : memref<904x256xf32, #tpu.memory_space<vmem>>, vector<256x32xf32>
    %cst_15 = arith.constant dense<0.000000e+00> : vector<8x32xf32>
    %23 = tpu.matmul %21, %22, %cst_15 {dimension_numbers = #tpu.dot_dimension_numbers<[1], [0], [0], [1], [0, 0, 1, 1], [], []>} : vector<8x256xf32>, vector<256x32xf32>, vector<8x32xf32> -> vector<8x32xf32>
    %c3 = arith.constant 3 : index
    %c0_16 = arith.constant 0 : index
    %24 = vector.load %arg3[%c3, %c0_16] : memref<8x256xf32, #tpu.memory_space<vmem>>, vector<1x32xf32>
    %25 = vector.broadcast %24 : vector<1x32xf32> to vector<8x32xf32>
    %26 = arith.addf %23, %25 : vector<8x32xf32>
    %cst_17 = arith.constant 0.000000e+00 : f32
    %27 = vector.broadcast %cst_17 : f32 to vector<8x32xf32>
    %28 = arith.maximumf %26, %27 : vector<8x32xf32>
    %c800 = arith.constant 800 : index
    %c0_18 = arith.constant 0 : index
    %29 = vector.load %arg2[%c800, %c0_18] : memref<904x256xf32, #tpu.memory_space<vmem>>, vector<1x32xf32>
    %30 = vector.broadcast %29 : vector<1x32xf32> to vector<8x32xf32>
    %31 = arith.mulf %28, %30 : vector<8x32xf32>
    %cst_19 = arith.constant dense<0.000000e+00> : vector<8xf32>
    %32 = vector.multi_reduction <add>, %31, %cst_19 [1] : vector<8x32xf32> to vector<8xf32>
    %33 = vector.shape_cast %32 : vector<8xf32> to vector<8x1xf32>
    %c4 = arith.constant 4 : index
    %c0_20 = arith.constant 0 : index
    %34 = vector.load %arg3[%c4, %c0_20] : memref<8x256xf32, #tpu.memory_space<vmem>>, vector<1x1xf32>
    %35 = vector.broadcast %34 : vector<1x1xf32> to vector<8x1xf32>
    %36 = arith.addf %33, %35 : vector<8x1xf32>
    %cst_21 = arith.constant 0.000000e+00 : f32
    %37 = vector.broadcast %cst_21 : f32 to vector<8x1xf32>
    %38 = arith.subf %37, %36 : vector<8x1xf32>
    %39 = math.exp %38 : vector<8x1xf32>
    %cst_22 = arith.constant 1.000000e+00 : f32
    %40 = vector.broadcast %cst_22 : f32 to vector<8x1xf32>
    %41 = arith.addf %40, %39 : vector<8x1xf32>
    %cst_23 = arith.constant 1.000000e+00 : f32
    %42 = vector.broadcast %cst_23 : f32 to vector<8x1xf32>
    %43 = arith.divf %42, %41 : vector<8x1xf32>
    %c840 = arith.constant 840 : index
    %c0_24 = arith.constant 0 : index
    %44 = vector.load %arg2[%c840, %c0_24] : memref<904x256xf32, #tpu.memory_space<vmem>>, vector<32x4xf32>
    %cst_25 = arith.constant dense<0.000000e+00> : vector<8x4xf32>
    %45 = tpu.matmul %0, %44, %cst_25 {dimension_numbers = #tpu.dot_dimension_numbers<[1], [0], [0], [1], [0, 0, 1, 1], [], []>} : vector<8x32xf32>, vector<32x4xf32>, vector<8x4xf32> -> vector<8x4xf32>
    %c872 = arith.constant 872 : index
    %c0_26 = arith.constant 0 : index
    %46 = vector.load %arg2[%c872, %c0_26] : memref<904x256xf32, #tpu.memory_space<vmem>>, vector<32x4xf32>
    %cst_27 = arith.constant dense<0.000000e+00> : vector<8x4xf32>
    %47 = tpu.matmul %0, %46, %cst_27 {dimension_numbers = #tpu.dot_dimension_numbers<[1], [0], [0], [1], [0, 0, 1, 1], [], []>} : vector<8x32xf32>, vector<32x4xf32>, vector<8x4xf32> -> vector<8x4xf32>
    %48 = arith.mulf %45, %47 : vector<8x4xf32>
    %cst_28 = arith.constant dense<0.000000e+00> : vector<8xf32>
    %49 = vector.multi_reduction <add>, %48, %cst_28 [1] : vector<8x4xf32> to vector<8xf32>
    %50 = vector.shape_cast %49 : vector<8xf32> to vector<8x1xf32>
    %c808 = arith.constant 808 : index
    %c0_29 = arith.constant 0 : index
    %51 = vector.load %arg2[%c808, %c0_29] : memref<904x256xf32, #tpu.memory_space<vmem>>, vector<1x16xf32>
    %52 = vector.broadcast %50 : vector<8x1xf32> to vector<8x16xf32>
    %53 = vector.broadcast %51 : vector<1x16xf32> to vector<8x16xf32>
    %54 = arith.mulf %52, %53 : vector<8x16xf32>
    %c5 = arith.constant 5 : index
    %c0_30 = arith.constant 0 : index
    %55 = vector.load %arg3[%c5, %c0_30] : memref<8x256xf32, #tpu.memory_space<vmem>>, vector<1x16xf32>
    %56 = vector.broadcast %55 : vector<1x16xf32> to vector<8x16xf32>
    %57 = arith.addf %54, %56 : vector<8x16xf32>
    %cst_31 = arith.constant 0.000000e+00 : f32
    %58 = vector.broadcast %cst_31 : f32 to vector<8x16xf32>
    %59 = arith.maximumf %57, %58 : vector<8x16xf32>
    %c816 = arith.constant 816 : index
    %c0_32 = arith.constant 0 : index
    %60 = vector.load %arg2[%c816, %c0_32] : memref<904x256xf32, #tpu.memory_space<vmem>>, vector<16x16xf32>
    %cst_33 = arith.constant dense<0.000000e+00> : vector<8x16xf32>
    %61 = tpu.matmul %59, %60, %cst_33 {dimension_numbers = #tpu.dot_dimension_numbers<[1], [0], [0], [1], [0, 0, 1, 1], [], []>} : vector<8x16xf32>, vector<16x16xf32>, vector<8x16xf32> -> vector<8x16xf32>
    %c6 = arith.constant 6 : index
    %c0_34 = arith.constant 0 : index
    %62 = vector.load %arg3[%c6, %c0_34] : memref<8x256xf32, #tpu.memory_space<vmem>>, vector<1x16xf32>
    %63 = vector.broadcast %62 : vector<1x16xf32> to vector<8x16xf32>
    %64 = arith.addf %61, %63 : vector<8x16xf32>
    %cst_35 = arith.constant 0.000000e+00 : f32
    %65 = vector.broadcast %cst_35 : f32 to vector<8x16xf32>
    %66 = arith.maximumf %64, %65 : vector<8x16xf32>
    %c832 = arith.constant 832 : index
    %c0_36 = arith.constant 0 : index
    %67 = vector.load %arg2[%c832, %c0_36] : memref<904x256xf32, #tpu.memory_space<vmem>>, vector<1x16xf32>
    %68 = vector.broadcast %67 : vector<1x16xf32> to vector<8x16xf32>
    %69 = arith.mulf %66, %68 : vector<8x16xf32>
    %cst_37 = arith.constant dense<0.000000e+00> : vector<8xf32>
    %70 = vector.multi_reduction <add>, %69, %cst_37 [1] : vector<8x16xf32> to vector<8xf32>
    %71 = vector.shape_cast %70 : vector<8xf32> to vector<8x1xf32>
    %c7 = arith.constant 7 : index
    %c0_38 = arith.constant 0 : index
    %72 = vector.load %arg3[%c7, %c0_38] : memref<8x256xf32, #tpu.memory_space<vmem>>, vector<1x1xf32>
    %73 = vector.broadcast %72 : vector<1x1xf32> to vector<8x1xf32>
    %74 = arith.addf %71, %73 : vector<8x1xf32>
    %cst_39 = arith.constant 0.000000e+00 : f32
    %75 = vector.broadcast %cst_39 : f32 to vector<8x1xf32>
    %76 = arith.subf %75, %74 : vector<8x1xf32>
    %77 = math.exp %76 : vector<8x1xf32>
    %cst_40 = arith.constant 1.000000e+00 : f32
    %78 = vector.broadcast %cst_40 : f32 to vector<8x1xf32>
    %79 = arith.addf %78, %77 : vector<8x1xf32>
    %cst_41 = arith.constant 1.000000e+00 : f32
    %80 = vector.broadcast %cst_41 : f32 to vector<8x1xf32>
    %81 = arith.divf %80, %79 : vector<8x1xf32>
    %cst_42 = arith.constant 0.699999988 : f32
    %82 = vector.broadcast %cst_42 : f32 to vector<8x1xf32>
    %83 = arith.mulf %82, %43 : vector<8x1xf32>
    %cst_43 = arith.constant 3.000000e-01 : f32
    %84 = vector.broadcast %cst_43 : f32 to vector<8x1xf32>
    %85 = arith.mulf %84, %81 : vector<8x1xf32>
    %86 = arith.addf %83, %85 : vector<8x1xf32>
    %c0_44 = arith.constant 0 : index
    %c0_45 = arith.constant 0 : index
    %87 = vector.load %arg4[%c0_44, %c0_45] : memref<8x1xf32, #tpu.memory_space<vmem>>, vector<8x1xf32>
    tpu.vector_store %arg4[%c0_44, %c0_45], %86 {strides = array<i32>} : memref<8x1xf32, #tpu.memory_space<vmem>>, vector<8x1xf32>,
    return
  }
  func.func @transform_0(%arg0: i32) -> (i32, i32) {
    %c0_i32 = arith.constant 0 : i32
    %c0_i32_0 = arith.constant 0 : i32
    return %arg0, %c0_i32 : i32, i32
  }
  func.func @transform_1(%arg0: i32) -> (i32, i32) {
    %c0_i32 = arith.constant 0 : i32
    %c0_i32_0 = arith.constant 0 : i32
    %c0_i32_1 = arith.constant 0 : i32
    return %c0_i32, %c0_i32_0 : i32, i32
  }
  func.func @transform_2(%arg0: i32) -> (i32, i32) {
    %c0_i32 = arith.constant 0 : i32
    %c0_i32_0 = arith.constant 0 : i32
    %c0_i32_1 = arith.constant 0 : i32
    return %c0_i32, %c0_i32_0 : i32, i32
  }
  func.func @transform_3(%arg0: i32) -> (i32, i32) {
    %c0_i32 = arith.constant 0 : i32
    %c0_i32_0 = arith.constant 0 : i32
    return %arg0, %c0_i32 : i32, i32
  }
}

</mosaic_0001>

<bundles_post_ra>
// kernel: tpu_custom_call.1
= control target key start
LH: loop header
LB: loop body
LE: loop exit
PB: predicated region body
PF: predicated region fallthrough
CT: control target
= control target key end

     0   :  { %8 = vsyncpa [#allocation3], 0  ;;  %s791_s0 = inlined_call_operand.hbm [shape: f32[8,32], index: 0, kind: input, shape index: {}]   ;;  %s792_s1 = inlined_call_operand.hbm [shape: f32[904,256], index: 1, kind: input, shape index: {}]   ;;  %s793_s2 = inlined_call_operand.hbm [shape: f32[8,256], index: 2, kind: input, shape index: {}]   ;;  %s794_s3 = inlined_call_operand.vmem [shape: f32[8,1], index: 3, kind: output, shape index: {}]  }
   0x1   :  { %9 = vsyncpa [#allocation5], 0  ;;  %s25_s14 = sshll.u32 %s792_s1, 4  ;;  %s741_s15 = smov [#allocation4]   ;;  %s26_s14 = int_to_ptr.hbm [resolvable:$true] %s25_s14 }
   0x2   :  { %s27_s16 = sshll.u32 %s741_s15, 4  ;;  %s15_s19 = sshll.u32 %s791_s0, 4  ;;  %s28_s16 = int_to_ptr.vmem [resolvable:$true] %s27_s16  ;;  %s16_s19 = int_to_ptr.hbm [resolvable:$true] %s15_s19 }
   0x3   :  { %s742_s20 = smov 256   ;;  %s743_s21 = smov 16  }
   0x4   :  { %33 = dma.hbm_to_vmem [thread:$0]  %s26_s14, 28928, %s28_s16, [#allocation5], %s742_s20, %s742_s20, %s743_s21  }
   0x5   :  { %s744_s22 = smov [#allocation2]   ;;  %s39_s26 = sshll.u32 %s793_s2, 4  ;;  %s40_s26 = int_to_ptr.hbm [resolvable:$true] %s39_s26 }
   0x6   :  { %s17_s23 = sshll.u32 %s744_s22, 4  ;;  %s745_s1 = smov [#allocation6]   ;;  %s18_s23 = int_to_ptr.vmem [resolvable:$true] %s17_s23 }
   0x7   :  { %20 = dma.hbm_to_vmem [thread:$0]  %s16_s19, 128, %s18_s23, [#allocation3]  }
   0x8   :  { %s41_s27 = sshll.u32 %s745_s1, 4  ;;  %s42_s27 = int_to_ptr.vmem [resolvable:$true] %s41_s27 }
   0x9   :  { %44 = dma.hbm_to_vmem [thread:$0]  %s40_s26, 256, %s42_s27, [#allocation5]  }
   0xa   :  { %737 = dma.done.wait [#allocation3], 128  }
   0xb   :  { %738 = vsyncadd [#allocation3], 4294967168 }
   0xc   :  { %739 = dma.done.wait [#allocation5], 29184  }
   0xd   :  { %740 = vsyncadd [#allocation5], 4294938112  ;;  %v64_v0 = vld [vmem:[#allocation4 + $0x30] sm:$0xff]  ;;  %v62_v1 = vld [vmem:[#allocation4 + $0x20] sm:$0xff]  ;;  %vm72_vm0 = vcmask 261120   ;;  %vm573_vm1 = vcmask 31744  }
   0xe   :  { %v65_v2 = vld [vmem:[#allocation4 + $0x38] sm:$0xff]  ;;  %88 = vmatpush.msra.mxu0 %v64_v0  ;;  %v63_v3 = vld [vmem:[#allocation4 + $0x28] sm:$0xff]  ;;  %v60_v4 = vld [vmem:[#allocation4 + $0x10] sm:$0xff]  ;;  %vm585_vm2 = vcmask 130048   ;;  %vm639_vm11 = vcmask 7168  }
   0xf   :  { %108 = vmatpush.msra.mxu1 %v65_v2  ;;  %v61_v5 = vld [vmem:[#allocation4 + $0x18] sm:$0xff]  ;;  %v148_v6 = vld [vmem:[#allocation4 + $0x130] sm:$0xff]  ;;  %v146_v7 = vld [vmem:[#allocation4 + $0x120] sm:$0xff] }
  0x10   :  { %89 = vmatpush.msra.mxu0 %v62_v1  ;;  %v58_v8 = vld [vmem:[#allocation4] sm:$0xff]  ;;  %v59_v9 = vld [vmem:[#allocation4 + $0x8] sm:$0xff]  ;;  %189 = vmatpush.msra.mxu2 %v148_v6  ;;  %v180_v10 = vld [vmem:[#allocation4 + $0x230] sm:$0xff] }
  0x11   :  { %109 = vmatpush.msra.mxu1 %v63_v3  ;;  %v775_v11 = vld [vmem:[#allocation2] sm:$0xff]  ;;  %209 = vmatpush.msra.mxu3 %v180_v10  ;;  %v144_v14 = vld [vmem:[#allocation4 + $0x110] sm:$0xff]  ;;  %v178_v15 = vld [vmem:[#allocation4 + $0x220] sm:$0xff] }
  0x12   :  { %90 = vmatpush.msra.mxu0 %v60_v4  ;;  %v149_v12 = vld [vmem:[#allocation4 + $0x138] sm:$0xff]  ;;  %190 = vmatpush.msra.mxu2 %v146_v7  ;;  %v147_v16 = vld [vmem:[#allocation4 + $0x128] sm:$0xff]  ;;  %v142_v18 = vld [vmem:[#allocation4 + $0x100] sm:$0xff] }
  0x13   :  { %110 = vmatpush.msra.mxu1 %v61_v5  ;;  %v181_v13 = vld [vmem:[#allocation4 + $0x238] sm:$0xff]  ;;  %v179_v17 = vld [vmem:[#allocation4 + $0x228] sm:$0xff]  ;;  %v176_v19 = vld [vmem:[#allocation4 + $0x210] sm:$0xff]  ;;  %210 = vmatpush.msra.mxu3 %v178_v15 }
  0x14   :  { %91 = vmatpush.msra.mxu0 %v58_v8  ;;  %191 = vmatpush.msra.mxu2 %v144_v14  ;;  %v145_v20 = vld [vmem:[#allocation4 + $0x118] sm:$0xff]  ;;  %v140_v22 = vld [vmem:[#allocation4 + $0xf0] sm:$0xff]  ;;  %v174_v23 = vld [vmem:[#allocation4 + $0x200] sm:$0xff] }
  0x15   :  { %111 = vmatpush.msra.mxu1 %v59_v9  ;;  %647 = vmatmul.msk.f32.vlgmr.msra.gmra.mxu0 %vm72_vm0, %v775_v11  ;;  %v177_v21 = vld [vmem:[#allocation4 + $0x218] sm:$0xff]  ;;  %v143_v24 = vld [vmem:[#allocation4 + $0x108] sm:$0xff]  ;;  %v138_v26 = vld [vmem:[#allocation4 + $0xe0] sm:$0xff] }
  0x16   :  { %648 = vmatmul.msk.f32.vlgmr.msra.gmra.mxu1 %vm72_vm0, %v775_v11  ;;  %229 = vmatpush.msrb.mxu0 %v149_v12  ;;  %v175_v25 = vld [vmem:[#allocation4 + $0x208] sm:$0xff]  ;;  %v172_v27 = vld [vmem:[#allocation4 + $0x1f0] sm:$0xff]  ;;  %v141_v28 = vld [vmem:[#allocation4 + $0xf8] sm:$0xff] }
  0x17   :  { %249 = vmatpush.msrb.mxu1 %v181_v13  ;;  %192 = vmatpush.msra.mxu2 %v142_v18  ;;  %v173_v29 = vld [vmem:[#allocation4 + $0x1f8] sm:$0xff]  ;;  %v136_v30 = vld [vmem:[#allocation4 + $0xd0] sm:$0xff]  ;;  %v170_v31 = vld [vmem:[#allocation4 + $0x1e0] sm:$0xff] }
  0x18   :  { %230 = vmatpush.msrb.mxu0 %v147_v16  ;;  %211 = vmatpush.msra.mxu3 %v176_v19  ;;  %v139_v32 = vld [vmem:[#allocation4 + $0xe8] sm:$0xff]  ;;  %v134_v34 = vld [vmem:[#allocation4 + $0xc0] sm:$0xff]  ;;  %v168_v35 = vld [vmem:[#allocation4 + $0x1d0] sm:$0xff] }
  0x19   :  { %250 = vmatpush.msrb.mxu1 %v179_v17  ;;  %193 = vmatpush.msra.mxu2 %v140_v22  ;;  %v171_v33 = vld [vmem:[#allocation4 + $0x1e8] sm:$0xff]  ;;  %v137_v36 = vld [vmem:[#allocation4 + $0xd8] sm:$0xff]  ;;  %v132_v38 = vld [vmem:[#allocation4 + $0xb0] sm:$0xff] }
  0x1a   :  { %231 = vmatpush.msrb.mxu0 %v145_v20  ;;  %212 = vmatpush.msra.mxu3 %v174_v23  ;;  %v169_v37 = vld [vmem:[#allocation4 + $0x1d8] sm:$0xff]  ;;  %v166_v39 = vld [vmem:[#allocation4 + $0x1c0] sm:$0xff]  ;;  %v135_v40 = vld [vmem:[#allocation4 + $0xc8] sm:$0xff] }
  0x1b   :  { %251 = vmatpush.msrb.mxu1 %v177_v21  ;;  %194 = vmatpush.msra.mxu2 %v138_v26  ;;  %v167_v41 = vld [vmem:[#allocation4 + $0x1c8] sm:$0xff]  ;;  %v130_v42 = vld [vmem:[#allocation4 + $0xa0] sm:$0xff]  ;;  %v164_v43 = vld [vmem:[#allocation4 + $0x1b0] sm:$0xff] }
  0x1c   :  { %232 = vmatpush.msrb.mxu0 %v143_v24  ;;  %213 = vmatpush.msra.mxu3 %v172_v27  ;;  %v133_v44 = vld [vmem:[#allocation4 + $0xb8] sm:$0xff]  ;;  %v128_v46 = vld [vmem:[#allocation4 + $0x90] sm:$0xff]  ;;  %v162_v47 = vld [vmem:[#allocation4 + $0x1a0] sm:$0xff] }
  0x1d   :  { %252 = vmatpush.msrb.mxu1 %v175_v25  ;;  %195 = vmatpush.msra.mxu2 %v136_v30  ;;  %v165_v45 = vld [vmem:[#allocation4 + $0x1b8] sm:$0xff]  ;;  %v131_v48 = vld [vmem:[#allocation4 + $0xa8] sm:$0xff]  ;;  %v126_v50 = vld [vmem:[#allocation4 + $0x80] sm:$0xff] }
  0x1e   :  { %233 = vmatpush.msrb.mxu0 %v141_v28  ;;  %214 = vmatpush.msra.mxu3 %v170_v31  ;;  %v163_v49 = vld [vmem:[#allocation4 + $0x1a8] sm:$0xff]  ;;  %v160_v51 = vld [vmem:[#allocation4 + $0x190] sm:$0xff]  ;;  %v129_v52 = vld [vmem:[#allocation4 + $0x98] sm:$0xff] }
  0x1f   :  { %253 = vmatpush.msrb.mxu1 %v173_v29  ;;  %196 = vmatpush.msra.mxu2 %v134_v34  ;;  %v161_v53 = vld [vmem:[#allocation4 + $0x198] sm:$0xff]  ;;  %v124_v54 = vld [vmem:[#allocation4 + $0x70] sm:$0xff]  ;;  %v158_v55 = vld [vmem:[#allocation4 + $0x180] sm:$0xff] }
  0x20   :  { %234 = vmatpush.msrb.mxu0 %v139_v32  ;;  %215 = vmatpush.msra.mxu3 %v168_v35  ;;  %v127_v56 = vld [vmem:[#allocation4 + $0x88] sm:$0xff]  ;;  %v125_v58 = vld [vmem:[#allocation4 + $0x78] sm:$0xff]  ;;  %v122_v59 = vld [vmem:[#allocation4 + $0x60] sm:$0xff] }
  0x21   :  { %254 = vmatpush.msrb.mxu1 %v171_v33  ;;  %197 = vmatpush.msra.mxu2 %v132_v38  ;;  %v159_v57 = vld [vmem:[#allocation4 + $0x188] sm:$0xff]  ;;  %v156_v60 = vld [vmem:[#allocation4 + $0x170] sm:$0xff]  ;;  %v157_v62 = vld [vmem:[#allocation4 + $0x178] sm:$0xff] }
  0x22   :  { %235 = vmatpush.msrb.mxu0 %v137_v36  ;;  %216 = vmatpush.msra.mxu3 %v166_v39  ;;  %v123_v61 = vld [vmem:[#allocation4 + $0x68] sm:$0xff]  ;;  %v120_v63 = vld [vmem:[#allocation4 + $0x50] sm:$0xff]  ;;  %v154_v0 = vld [vmem:[#allocation4 + $0x160] sm:$0xff] }
  0x23   :  { %255 = vmatpush.msrb.mxu1 %v169_v37  ;;  %198 = vmatpush.msra.mxu2 %v130_v42  ;;  %v121_v1 = vld [vmem:[#allocation4 + $0x58] sm:$0xff]  ;;  %v155_v2 = vld [vmem:[#allocation4 + $0x168] sm:$0xff]  ;;  %v118_v3 = vld [vmem:[#allocation4 + $0x40] sm:$0xff] }
  0x24   :  { %236 = vmatpush.msrb.mxu0 %v135_v40  ;;  %217 = vmatpush.msra.mxu3 %v164_v43  ;;  %v152_v4 = vld [vmem:[#allocation4 + $0x150] sm:$0xff]  ;;  %v119_v5 = vld [vmem:[#allocation4 + $0x48] sm:$0xff]  ;;  %v153_v6 = vld [vmem:[#allocation4 + $0x158] sm:$0xff] }
  0x25   :  { %256 = vmatpush.msrb.mxu1 %v167_v41  ;;  %199 = vmatpush.msra.mxu2 %v128_v46  ;;  %v150_v7 = vld [vmem:[#allocation4 + $0x140] sm:$0xff]  ;;  %v151_v8 = vld [vmem:[#allocation4 + $0x148] sm:$0xff]  ;;  %v333_v9 = vld [vmem:[#allocation4 + $0x430] sm:$0xff] }
  0x26   :  { %237 = vmatpush.msrb.mxu0 %v133_v44  ;;  %218 = vmatpush.msra.mxu3 %v162_v47  ;;  %v334_v10 = vld [vmem:[#allocation4 + $0x438] sm:$0xff]  ;;  %v331_v12 = vld [vmem:[#allocation4 + $0x420] sm:$0xff]  ;;  %v332_v13 = vld [vmem:[#allocation4 + $0x428] sm:$0xff] }
  0x27   :  { %257 = vmatpush.msrb.mxu1 %v165_v45  ;;  %200 = vmatpush.msra.mxu2 %v126_v50  ;;  %v329_v14 = vld [vmem:[#allocation4 + $0x410] sm:$0xff]  ;;  %v302_v16 = vld [vmem:[#allocation4 + $0x338] sm:$0xff]  ;;  %v299_v18 = vld [vmem:[#allocation4 + $0x320] sm:$0xff] }
  0x28   :  { %238 = vmatpush.msrb.mxu0 %v131_v48  ;;  %219 = vmatpush.msra.mxu3 %v160_v51  ;;  %v301_v15 = vld [vmem:[#allocation4 + $0x330] sm:$0xff]  ;;  %v330_v17 = vld [vmem:[#allocation4 + $0x418] sm:$0xff]  ;;  %v327_v19 = vld [vmem:[#allocation4 + $0x400] sm:$0xff] }
  0x29   :  { %258 = vmatpush.msrb.mxu1 %v163_v49  ;;  %201 = vmatpush.msra.mxu2 %v124_v54  ;;  %v300_v20 = vld [vmem:[#allocation4 + $0x328] sm:$0xff]  ;;  %v297_v21 = vld [vmem:[#allocation4 + $0x310] sm:$0xff]  ;;  %v298_v23 = vld [vmem:[#allocation4 + $0x318] sm:$0xff] }
  0x2a   :  { %239 = vmatpush.msrb.mxu0 %v129_v52  ;;  %220 = vmatpush.msra.mxu3 %v158_v55  ;;  %v328_v22 = vld [vmem:[#allocation4 + $0x408] sm:$0xff]  ;;  %v325_v24 = vld [vmem:[#allocation4 + $0x3f0] sm:$0xff]  ;;  %v295_v25 = vld [vmem:[#allocation4 + $0x300] sm:$0xff] }
  0x2b   :  { %259 = vmatpush.msrb.mxu1 %v161_v53  ;;  %202 = vmatpush.msra.mxu2 %v122_v59  ;;  %v326_v26 = vld [vmem:[#allocation4 + $0x3f8] sm:$0xff]  ;;  %v296_v27 = vld [vmem:[#allocation4 + $0x308] sm:$0xff]  ;;  %v323_v28 = vld [vmem:[#allocation4 + $0x3e0] sm:$0xff] }
  0x2c   :  { %240 = vmatpush.msrb.mxu0 %v127_v56  ;;  %221 = vmatpush.msra.mxu3 %v156_v60  ;;  %v293_v29 = vld [vmem:[#allocation4 + $0x2f0] sm:$0xff]  ;;  %v324_v30 = vld [vmem:[#allocation4 + $0x3e8] sm:$0xff]  ;;  %v294_v31 = vld [vmem:[#allocation4 + $0x2f8] sm:$0xff] }
  0x2d   :  { %260 = vmatpush.msrb.mxu1 %v159_v57  ;;  %203 = vmatpush.msra.mxu2 %v120_v63  ;;  %v321_v32 = vld [vmem:[#allocation4 + $0x3d0] sm:$0xff]  ;;  %v291_v33 = vld [vmem:[#allocation4 + $0x2e0] sm:$0xff]  ;;  %v322_v34 = vld [vmem:[#allocation4 + $0x3d8] sm:$0xff] }
  0x2e   :  { %241 = vmatpush.msrb.mxu0 %v125_v58  ;;  %222 = vmatpush.msra.mxu3 %v154_v0  ;;  %v292_v35 = vld [vmem:[#allocation4 + $0x2e8] sm:$0xff]  ;;  %v319_v36 = vld [vmem:[#allocation4 + $0x3c0] sm:$0xff]  ;;  %v289_v37 = vld [vmem:[#allocation4 + $0x2d0] sm:$0xff] }
  0x2f   :  { %261 = vmatpush.msrb.mxu1 %v157_v62  ;;  %204 = vmatpush.msra.mxu2 %v118_v3  ;;  %v320_v38 = vld [vmem:[#allocation4 + $0x3c8] sm:$0xff]  ;;  %v290_v39 = vld [vmem:[#allocation4 + $0x2d8] sm:$0xff]  ;;  %v317_v40 = vld [vmem:[#allocation4 + $0x3b0] sm:$0xff] }
  0x30   :  { %242 = vmatpush.msrb.mxu0 %v123_v61  ;;  %223 = vmatpush.msra.mxu3 %v152_v4  ;;  %v287_v41 = vld [vmem:[#allocation4 + $0x2c0] sm:$0xff]  ;;  %v318_v42 = vld [vmem:[#allocation4 + $0x3b8] sm:$0xff]  ;;  %v288_v43 = vld [vmem:[#allocation4 + $0x2c8] sm:$0xff] }
  0x31   :  { %262 = vmatpush.msrb.mxu1 %v155_v2  ;;  %342 = vmatpush.msrb.mxu2 %v301_v15  ;;  %v315_v44 = vld [vmem:[#allocation4 + $0x3a0] sm:$0xff]  ;;  %v285_v45 = vld [vmem:[#allocation4 + $0x2b0] sm:$0xff]  ;;  %v316_v46 = vld [vmem:[#allocation4 + $0x3a8] sm:$0xff] }
  0x32   :  { %243 = vmatpush.msrb.mxu0 %v121_v1  ;;  %224 = vmatpush.msra.mxu3 %v150_v7  ;;  %v286_v47 = vld [vmem:[#allocation4 + $0x2b8] sm:$0xff]  ;;  %v313_v48 = vld [vmem:[#allocation4 + $0x390] sm:$0xff]  ;;  %v311_v51 = vld [vmem:[#allocation4 + $0x380] sm:$0xff] }
  0x33   :  { %263 = vmatpush.msrb.mxu1 %v153_v6  ;;  %343 = vmatpush.msrb.mxu2 %v299_v18  ;;  %v314_v49 = vld [vmem:[#allocation4 + $0x398] sm:$0xff]  ;;  %v312_v52 = vld [vmem:[#allocation4 + $0x388] sm:$0xff]  ;;  %v283_v61 = vld [vmem:[#allocation4 + $0x2a0] sm:$0xff] }
  0x34   :  { %244 = vmatpush.msrb.mxu0 %v119_v5  ;;  %362 = vmatpush.msrb.mxu3 %v333_v9  ;;  %v66_v50 = vld [vmem:[#allocation6] ss:$8 sm:$0x3]  ;;  %v284_v63 = vld [vmem:[#allocation4 + $0x2a8] sm:$0xff]  ;;  %v307_v2 = vld [vmem:[#allocation4 + $0x360] sm:$0xff] }
  0x35   :  { %264 = vmatpush.msrb.mxu1 %v151_v8  ;;  %344 = vmatpush.msrb.mxu2 %v297_v21  ;;  %v68_v53 = vperm.slane %v66_v50, 0  ;;  %v69_v54 = vperm.slane %v66_v50, 1  ;;  %v309_v62 = vld [vmem:[#allocation4 + $0x370] sm:$0xff]  ;;  %v310_v0 = vld [vmem:[#allocation4 + $0x378] sm:$0xff]  ;;  %v308_v4 = vld [vmem:[#allocation4 + $0x368] sm:$0xff] }
  0x36   :  { %363 = vmatpush.msrb.mxu3 %v331_v12  ;;  %382 = vmatpush.msra.mxu0 %v302_v16  ;;  %v281_v1 = vld [vmem:[#allocation4 + $0x290] sm:$0xff]  ;;  %v282_v3 = vld [vmem:[#allocation4 + $0x298] sm:$0xff]  ;;  %v279_v5 = vld [vmem:[#allocation4 + $0x280] sm:$0xff] }
  0x37   :  { %402 = vmatpush.msra.mxu1 %v334_v10  ;;  %345 = vmatpush.msrb.mxu2 %v295_v25  ;;  %v305_v6 = vld [vmem:[#allocation4 + $0x350] sm:$0xff]  ;;  %v280_v7 = vld [vmem:[#allocation4 + $0x288] sm:$0xff]  ;;  %v306_v8 = vld [vmem:[#allocation4 + $0x358] sm:$0xff] }
  0x38   :  { %364 = vmatpush.msrb.mxu3 %v329_v14  ;;  %383 = vmatpush.msra.mxu0 %v300_v20  ;;  %v277_v9 = vld [vmem:[#allocation4 + $0x270] sm:$0xff]  ;;  %v303_v10 = vld [vmem:[#allocation4 + $0x340] sm:$0xff]  ;;  %v278_v12 = vld [vmem:[#allocation4 + $0x278] sm:$0xff] }
  0x39   :  { %403 = vmatpush.msra.mxu1 %v332_v13  ;;  %346 = vmatpush.msrb.mxu2 %v293_v29  ;;  %v304_v13 = vld [vmem:[#allocation4 + $0x348] sm:$0xff]  ;;  %v275_v14 = vld [vmem:[#allocation4 + $0x260] sm:$0xff]  ;;  %v273_v16 = vld [vmem:[#allocation4 + $0x250] sm:$0xff] }
  0x3a   :  { %365 = vmatpush.msrb.mxu3 %v327_v19  ;;  %384 = vmatpush.msra.mxu0 %v298_v23  ;;  %v276_v15 = vld [vmem:[#allocation4 + $0x268] sm:$0xff]  ;;  %v271_v18 = vld [vmem:[#allocation4 + $0x240] sm:$0xff]  ;;  %v550_v23 = vld [vmem:[#allocation4 + $0x6f0] sm:$0xff] }
  0x3b   :  { %404 = vmatpush.msra.mxu1 %v330_v17  ;;  %347 = vmatpush.msrb.mxu2 %v291_v33  ;;  %v274_v17 = vld [vmem:[#allocation4 + $0x258] sm:$0xff]  ;;  %v272_v19 = vld [vmem:[#allocation4 + $0x248] sm:$0xff]  ;;  %v527_v20 = vld [vmem:[#allocation4 + $0x6c0] sm:$0xff] }
  0x3c   :  { %366 = vmatpush.msrb.mxu3 %v325_v24  ;;  %385 = vmatpush.msra.mxu0 %v296_v27  ;;  %v551_v21 = vld [vmem:[#allocation4 + $0x700] sm:$0xff]  ;;  %v548_v27 = vld [vmem:[#allocation4 + $0x6d0] sm:$0xff] }
  0x3d   :  { %405 = vmatpush.msra.mxu1 %v328_v22  ;;  %348 = vmatpush.msrb.mxu2 %v289_v37  ;;  %v526_v22 = vld [vmem:[#allocation4 + $0x6b0] sm:$0xff]  ;;  %v525_v24 = vld [vmem:[#allocation4 + $0x6a0] sm:$0xff] }
  0x3e   :  { %367 = vmatpush.msrb.mxu3 %v323_v28  ;;  %386 = vmatpush.msra.mxu0 %v294_v31  ;;  %v549_v25 = vld [vmem:[#allocation4 + $0x6e0] sm:$0xff]  ;;  %v455_v28 = vld [vmem:[#allocation4 + $0x630] sm:$0xff] }
  0x3f   :  { %406 = vmatpush.msra.mxu1 %v326_v26  ;;  %349 = vmatpush.msrb.mxu2 %v287_v41  ;;  %v524_v26 = vld [vmem:[#allocation4 + $0x690] sm:$0xff]  ;;  %v454_v29 = vld [vmem:[#allocation4 + $0x620] sm:$0xff] }
  0x40   :  { %368 = vmatpush.msrb.mxu3 %v321_v32  ;;  %387 = vmatpush.msra.mxu0 %v292_v35  ;;  %v438_v31 = vld [vmem:[#allocation4 + $0x520] sm:$0xff]  ;;  %v453_v32 = vld [vmem:[#allocation4 + $0x610] sm:$0xff] }
  0x41   :  { %407 = vmatpush.msra.mxu1 %v324_v30  ;;  %350 = vmatpush.msrb.mxu2 %v285_v45  ;;  %v439_v30 = vld [vmem:[#allocation4 + $0x530] sm:$0xff]  ;;  %v434_v41 = vld [vmem:[#allocation4 + $0x4e0] sm:$0xff] }
  0x42   :  { %369 = vmatpush.msrb.mxu3 %v319_v36  ;;  %388 = vmatpush.msra.mxu0 %v290_v39  ;;  %v437_v33 = vld [vmem:[#allocation4 + $0x510] sm:$0xff]  ;;  %v436_v36 = vld [vmem:[#allocation4 + $0x500] sm:$0xff] }
  0x43   :  { %408 = vmatpush.msra.mxu1 %v322_v34  ;;  %351 = vmatpush.msrb.mxu2 %v283_v61  ;;  %v452_v34 = vld [vmem:[#allocation4 + $0x600] sm:$0xff]  ;;  %v183_v35 = vld [vmem:[#allocation6 + $0x1] ss:$8 sm:$0x3] }
  0x44   :  { %370 = vmatpush.msrb.mxu3 %v317_v40  ;;  %389 = vmatpush.msra.mxu0 %v288_v43  ;;  %v451_v37 = vld [vmem:[#allocation4 + $0x5f0] sm:$0xff]  ;;  %v186_v39 = vperm.slane %v183_v35, 1  ;;  %v450_v40 = vld [vmem:[#allocation4 + $0x5e0] sm:$0xff] }
  0x45   :  { %409 = vmatpush.msra.mxu1 %v320_v38  ;;  %352 = vmatpush.msrb.mxu2 %v281_v1  ;;  %v435_v38 = vld [vmem:[#allocation4 + $0x4f0] sm:$0xff]  ;;  %v444_v61 = vld [vmem:[#allocation4 + $0x580] sm:$0xff] }
  0x46   :  { %371 = vmatpush.msrb.mxu3 %v315_v44  ;;  %390 = vmatpush.msra.mxu0 %v286_v47  ;;  %v442_v1 = vld [vmem:[#allocation4 + $0x560] sm:$0xff] }
  0x47   :  { %410 = vmatpush.msra.mxu1 %v318_v42  ;;  %353 = vmatpush.msrb.mxu2 %v279_v5  ;;  %v449_v42 = vld [vmem:[#allocation4 + $0x5d0] sm:$0xff]  ;;  %v426_v5 = vld [vmem:[#allocation4 + $0x460] sm:$0xff] }
  0x48   :  { %372 = vmatpush.msrb.mxu3 %v313_v48  ;;  %391 = vmatpush.msra.mxu0 %v284_v63  ;;  %v185_v48 = vperm.slane %v183_v35, 0  ;;  %v443_v63 = vld [vmem:[#allocation4 + $0x570] sm:$0xff] }
  0x49   :  { %411 = vmatpush.msra.mxu1 %v316_v46  ;;  %354 = vmatpush.msrb.mxu2 %v277_v9  ;;  %v448_v46 = vld [vmem:[#allocation4 + $0x5c0] sm:$0xff]  ;;  %v336_v9 = vld [vmem:[#allocation6 + $0x2] ss:$8 sm:$0x3] }
  0x4a   :  { %373 = vmatpush.msrb.mxu3 %v311_v51  ;;  %392 = vmatpush.msra.mxu0 %v282_v3  ;;  %v427_v3 = vld [vmem:[#allocation4 + $0x470] sm:$0xff] }
  0x4b   :  { %412 = vmatpush.msra.mxu1 %v314_v49  ;;  %355 = vmatpush.msrb.mxu2 %v275_v14  ;;  %v447_v49 = vld [vmem:[#allocation4 + $0x5b0] sm:$0xff] }
  0x4c   :  { %374 = vmatpush.msrb.mxu3 %v309_v62  ;;  %393 = vmatpush.msra.mxu0 %v280_v7  ;;  %v430_v62 = vld [vmem:[#allocation4 + $0x4a0] sm:$0xff] }
  0x4d   :  { %413 = vmatpush.msra.mxu1 %v312_v52  ;;  %356 = vmatpush.msrb.mxu2 %v273_v16  ;;  %v424_v7 = vld [vmem:[#allocation4 + $0x440] sm:$0xff]  ;;  %v338_v16 = vperm.slane %v336_v9, 0 }
  0x4e   :  { %375 = vmatpush.msrb.mxu3 %v307_v2  ;;  %394 = vmatpush.msra.mxu0 %v278_v12  ;;  %v441_v2 = vld [vmem:[#allocation4 + $0x550] sm:$0xff] }
  0x4f   :  { %414 = vmatpush.msra.mxu1 %v310_v0  ;;  %357 = vmatpush.msrb.mxu2 %v271_v18  ;;  %v429_v0 = vld [vmem:[#allocation4 + $0x490] sm:$0xff] }
  0x50   :  { %376 = vmatpush.msrb.mxu3 %v305_v6  ;;  %395 = vmatpush.msra.mxu0 %v276_v15  ;;  %v425_v6 = vld [vmem:[#allocation4 + $0x450] sm:$0xff] }
  0x51   :  { %415 = vmatpush.msra.mxu1 %v308_v4  ;;  %v440_v4 = vld [vmem:[#allocation4 + $0x540] sm:$0xff] }
  0x52   :  { %377 = vmatpush.msrb.mxu3 %v303_v10  ;;  %396 = vmatpush.msra.mxu0 %v274_v17  ;;  %v339_v10 = vperm.slane %v336_v9, 1 }
  0x53   :  { %416 = vmatpush.msra.mxu1 %v306_v8  ;;  %v583_v8 = vld [vmem:[#allocation4 + $0x670] sm:$0xff] }
  0x54   :  { %397 = vmatpush.msra.mxu0 %v272_v19 }
  0x55   :  { %417 = vmatpush.msra.mxu1 %v304_v13 }
  0x92   :  { %v93_v55 = vpop.f32.mrf.mxu0 }
  0x93   :  { %v113_v56 = vpop.f32.mrf.mxu1  ;;  %v94_v57 = vadd.f32 %v93_v55, %v68_v53 }
  0x94   :  { %v114_v58 = vadd.f32 %v113_v56, %v69_v54  ;;  %v433_v56 = vld [vmem:[#allocation4 + $0x4d0] sm:$0xff] }
  0x95   :  { %v116_v59 = vmax.f32 %v94_v57, 0.0  ;;  %v446_v57 = vld [vmem:[#allocation4 + $0x5a0] sm:$0xff] }
  0x96   :  { %v117_v60 = vmax.f32 %v114_v58, 0.0  ;;  %v432_v58 = vld [vmem:[#allocation4 + $0x4c0] sm:$0xff] }
  0x97   :  { %205 = vmatmul.f32.vlgmr.msra.gmra.mxu2 %v116_v59  ;;  %245 = vmatmul.f32.vlgmr.msrb.gmra.mxu0 %v116_v59  ;;  %v445_v59 = vld [vmem:[#allocation4 + $0x590] sm:$0xff] }
  0x98   :  { %225 = vmatmul.f32.vlgmr.msra.gmra.mxu3 %v117_v60  ;;  %265 = vmatmul.f32.vlgmr.msrb.gmra.mxu1 %v117_v60  ;;  %v431_v60 = vld [vmem:[#allocation4 + $0x4b0] sm:$0xff] }
  0x99   :  { %540 = vmatpush.msrb.mxu0 %v527_v20  ;;  %564 = vmatpush.msrb.mxu1 %v551_v21 }
  0x9a   :  { %477 = vmatpush.msra.mxu3 %v455_v28  ;;  %457 = vmatpush.msra.mxu2 %v439_v30  ;;  %v577_v28 = vld [vmem:[#allocation4 + $0x650] ss:$0 sm:$0xff] }
  0x9b   :  { %541 = vmatpush.msrb.mxu0 %v526_v22  ;;  %565 = vmatpush.msrb.mxu1 %v550_v23 }
  0x9c   :  { %478 = vmatpush.msra.mxu3 %v454_v29  ;;  %458 = vmatpush.msra.mxu2 %v438_v31  ;;  %v579_v29 = vld [vmem:[#allocation6 + $0x5] ss:$0 sm:$0xff] }
  0x9d   :  { %542 = vmatpush.msrb.mxu0 %v525_v24  ;;  %566 = vmatpush.msrb.mxu1 %v549_v25 }
  0x9e   :  { %479 = vmatpush.msra.mxu3 %v453_v32  ;;  %459 = vmatpush.msra.mxu2 %v437_v33 }
  0x9f   :  { %543 = vmatpush.msrb.mxu0 %v524_v26  ;;  %567 = vmatpush.msrb.mxu1 %v548_v27  ;;  %v582_v27 = vld [vmem:[#allocation4 + $0x660] sm:$0xff] }
  0xa0   :  { %480 = vmatpush.msra.mxu3 %v452_v34  ;;  %460 = vmatpush.msra.mxu2 %v436_v36  ;;  %v456_v34 = vld [vmem:[#allocation6 + $0x3] ss:$0 sm:$0xff] }
  0xa2   :  { %481 = vmatpush.msra.mxu3 %v451_v37  ;;  %461 = vmatpush.msra.mxu2 %v435_v38 }
  0xa4   :  { %482 = vmatpush.msra.mxu3 %v450_v40  ;;  %462 = vmatpush.msra.mxu2 %v434_v41 }
  0xa6   :  { %483 = vmatpush.msra.mxu3 %v449_v42  ;;  %463 = vmatpush.msra.mxu2 %v433_v56 }
  0xa8   :  { %484 = vmatpush.msra.mxu3 %v448_v46  ;;  %464 = vmatpush.msra.mxu2 %v432_v58  ;;  %v610_v46 = vld [vmem:[#allocation4 + $0x680] ss:$0 sm:$0xff] }
  0xaa   :  { %485 = vmatpush.msra.mxu3 %v447_v49  ;;  %465 = vmatpush.msra.mxu2 %v431_v60 }
  0xac   :  { %486 = vmatpush.msra.mxu3 %v446_v57  ;;  %466 = vmatpush.msra.mxu2 %v430_v62  ;;  %v615_v57 = vld [vmem:[#allocation6 + $0x7] ss:$0 sm:$0xff] }
  0xae   :  { %487 = vmatpush.msra.mxu3 %v445_v59  ;;  %467 = vmatpush.msra.mxu2 %v429_v0 }
  0xb0   :  { %488 = vmatpush.msra.mxu3 %v444_v61 }
  0xb2   :  { %489 = vmatpush.msra.mxu3 %v443_v63 }
  0xb4   :  { %490 = vmatpush.msra.mxu3 %v442_v1 }
  0xb6   :  { %491 = vmatpush.msra.mxu3 %v441_v2 }
  0xb8   :  { %492 = vmatpush.msra.mxu3 %v440_v4 }
 0x114   :  { %v246_v43 = vpop.f32.mrf.mxu0 }
 0x115   :  { %v247_v44 = vadd.f32 %v246_v43, %v186_v39  ;;  %v266_v45 = vpop.f32.mrf.mxu1  ;;  %v498_v39 = vld [vmem:[#allocation4 + $0x640] ss:$0 sm:$0xff]  ;;  %v584_v43 = vld [vmem:[#allocation6 + $0x6] ss:$0 sm:$0xff] }
 0x117   :  { %v267_v47 = vadd.f32 %v266_v45, %v247_v44 }
 0x119   :  { %v270_v50 = vmax.f32 %v267_v47, 0.0 }
 0x11a   :  { %v206_v51 = vpop.f32.mrf.mxu2 }
 0x11b   :  { %v207_v52 = vadd.f32 %v206_v51, %v185_v48  ;;  %378 = vmatmul.f32.vlgmr.msrb.gmra.mxu3 %v270_v50  ;;  %418 = vmatmul.f32.vlgmr.msra.gmra.mxu1 %v270_v50  ;;  %v226_v53 = vpop.f32.mrf.mxu3  ;;  %v503_v50 = vld [vmem:[#allocation6 + $0x4] ss:$0 sm:$0xff] }
 0x11d   :  { %v227_v54 = vadd.f32 %v226_v53, %v207_v52 }
 0x11f   :  { %v269_v55 = vmax.f32 %v227_v54, 0.0 }
 0x121   :  { %358 = vmatmul.f32.vlgmr.msrb.gmra.mxu2 %v269_v55  ;;  %398 = vmatmul.f32.vlgmr.msra.gmra.mxu0 %v269_v55 }
 0x122   :  { %603 = vmatpush.msra.mxu0 %v583_v8 }
 0x123   :  { %650 = vmatmul.msk.f32.vlgmr.msrb.gmra.mxu1 %vm72_vm0, %v775_v11 }
 0x124   :  { %604 = vmatpush.msra.mxu0 %v582_v27 }
 0x129   :  { %649 = vmatmul.msk.f32.vlgmr.msrb.gmra.mxu0 %vm72_vm0, %v775_v11  ;;  %v428_v11 = vld [vmem:[#allocation4 + $0x480] sm:$0xff] }
 0x12a   :  { %468 = vmatpush.msra.mxu2 %v428_v11 }
 0x12c   :  { %469 = vmatpush.msra.mxu2 %v427_v3 }
 0x12e   :  { %470 = vmatpush.msra.mxu2 %v426_v5 }
 0x130   :  { %471 = vmatpush.msra.mxu2 %v425_v6 }
 0x132   :  { %472 = vmatpush.msra.mxu2 %v424_v7 }
 0x198   :  { %v419_v12 = vpop.f32.mrf.mxu1 }
 0x19e   :  { %v399_v13 = vpop.f32.mrf.mxu0  ;;  %v379_v21 = vpop.f32.mrf.mxu3 }
 0x19f   :  { %v400_v14 = vadd.f32 %v399_v13, %v339_v10 }
 0x1a0   :  { %v569_v19 = vpop.f32.mrf.mxu1 }
 0x1a1   :  { %v420_v15 = vadd.f32 %v419_v12, %v400_v14 }
 0x1a3   :  { %v423_v17 = vmax.f32 %v420_v15, 0.0 }
 0x1a4   :  { %v359_v18 = vpop.f32.mrf.mxu2 }
 0x1a5   :  { %v360_v20 = vadd.f32 %v359_v18, %v338_v16  ;;  %493 = vmatmul.f32.vlgmr.msra.gmra.mxu3 %v423_v17 }
 0x1a6   :  { %v545_v22 = vpop.f32.mrf.mxu0 }
 0x1a7   :  { %v380_v23 = vadd.f32 %v379_v21, %v360_v20  ;;  %v572_v24 = vmul.f32 %v569_v19, %v545_v22 }
 0x1a9   :  { %v422_v25 = vmax.f32 %v380_v23, 0.0  ;;  %v574_v26 = vsel %vm573_vm1, %v572_v24, 0.0 }
 0x1aa   :  { %575 = vadd.xlane.f32.xlu0 %v574_v26 }
 0x1ab   :  { %473 = vmatmul.f32.vlgmr.msra.gmra.mxu2 %v422_v25 }
 0x21d   :  { %v576_v30 = vpop.xlane.xlu0 %575 }
 0x21e   :  { %v578_v31 = vmul.f32 %v577_v28, %v576_v30 }
 0x220   :  { %v580_v32 = vadd.f32 %v579_v29, %v578_v31 }
 0x222   :  { %v581_v33 = vmax.f32 %v580_v32, 0.0 }
 0x224   :  { %651 = vmatmul.msk.f32.vlgmr.msra.gmra.mxu0 %vm585_vm2, %v581_v33 }
 0x228   :  { %v494_v37 = vpop.f32.mrf.mxu3 }
 0x22e   :  { %v474_v35 = vpop.f32.mrf.mxu2 }
 0x22f   :  { %v475_v36 = vadd.f32 %v474_v35, %v456_v34 }
 0x231   :  { %v495_v38 = vadd.f32 %v494_v37, %v475_v36 }
 0x233   :  { %v497_v40 = vmax.f32 %v495_v38, 0.0 }
 0x235   :  { %v499_v41 = vmul.f32 %v498_v39, %v497_v40 }
 0x237   :  { %v500_v42 = vsel %vm72_vm0, %v499_v41, 0.0 }
 0x238   :  { %501 = vadd.xlane.f32.xlu0 %v500_v42 }
 0x2a1   :  { %v606_v44 = vpop.f32.mrf.mxu0 }
 0x2a2   :  { %v607_v45 = vadd.f32 %v606_v44, %v584_v43 }
 0x2a4   :  { %v609_v47 = vmax.f32 %v607_v45, 0.0 }
 0x2a6   :  { %v611_v48 = vmul.f32 %v610_v46, %v609_v47 }
 0x2a8   :  { %v612_v49 = vsel %vm585_vm2, %v611_v48, 0.0 }
 0x2a9   :  { %613 = vadd.xlane.f32.xlu1 %v612_v49 }
 0x2ab   :  { %v502_v51 = vpop.xlane.xlu0 %501 }
 0x2ac   :  { %v504_v52 = vadd.f32 %v503_v50, %v502_v51 }
 0x2ae   :  { %v505_v53 = vsub.f32 0.0, %v504_v52 }
 0x2b0   :  { %v506_v54 = vmul.f32 1.442695, %v505_v53 }
 0x2b2   :  { %657 = vpow2.f32 %v506_v54 }
 0x2b8   :  { %v658_v55 = vpop.eup %657 }
 0x2b9   :  { %v508_v56 = vadd.f32 1.0, %v658_v55 }
 0x2bb   :  { %659 = vrcp.f32 %v508_v56  ;;  %v520_v6 = vand.u32 2147483648, %v508_v56  ;;  %vm514_vm4 = vweird.f32 %v508_v56  ;;  %v518_v7 = vand.u32 2147483647, %v508_v56 }
 0x2bd   :  { %v521_v14 = vor.u32 1.1754944e-38, %v520_v6  ;;  %vm519_vm7 = vcmp.eq.f32.partialorder %v518_v7, 8.507059e+37 }
 0x2c1   :  { %v660_v62 = vpop.eup %659 }
 0x2c2   :  { %v510_v63 = vmul.f32 %v660_v62, %v508_v56  ;;  %vm515_vm3 = vweird.f32 %v660_v62 }
 0x2c3   :  { %vm516_vm5 = vmor %vm514_vm4, %vm515_vm3 }
 0x2c4   :  { %v511_v11 = vsub.f32 1.0, %v510_v63 }
 0x2c6   :  { %v512_v2 = vmul.f32 %v660_v62, %v511_v11 }
 0x2c8   :  { %v513_v4 = vadd.f32 %v660_v62, %v512_v2 }
 0x2ca   :  { %v517_v10 = vsel %vm516_vm5, %v660_v62, %v513_v4 }
 0x2cb   :  { %v522_v16 = vsel %vm519_vm7, %v521_v14, %v517_v10 }
 0x2cc   :  { %v636_v20 = vmul.f32 0.7, %v522_v16 }
 0x31c   :  { %v614_v58 = vpop.xlane.xlu1 %613 }
 0x31d   :  { %v616_v59 = vadd.f32 %v615_v57, %v614_v58 }
 0x31f   :  { %v617_v60 = vsub.f32 0.0, %v616_v59 }
 0x321   :  { %v618_v61 = vmul.f32 1.442695, %v617_v60 }
 0x323   :  { %661 = vpow2.f32 %v618_v61 }
 0x329   :  { %v662_v0 = vpop.eup %661 }
 0x32a   :  { %v620_v1 = vadd.f32 1.0, %v662_v0 }
 0x32c   :  { %663 = vrcp.f32 %v620_v1  ;;  %v632_v9 = vand.u32 2147483648, %v620_v1  ;;  %v630_v13 = vand.u32 2147483647, %v620_v1  ;;  %vm626_vm8 = vweird.f32 %v620_v1 }
 0x32e   :  { %v633_v17 = vor.u32 1.1754944e-38, %v632_v9  ;;  %vm631_vm10 = vcmp.eq.f32.partialorder %v630_v13, 8.507059e+37 }
 0x332   :  { %v664_v3 = vpop.eup %663 }
 0x333   :  { %v622_v5 = vmul.f32 %v664_v3, %v620_v1  ;;  %vm627_vm6 = vweird.f32 %v664_v3 }
 0x334   :  { %vm628_vm9 = vmor %vm626_vm8, %vm627_vm6 }
 0x335   :  { %v623_v8 = vsub.f32 1.0, %v622_v5 }
 0x337   :  { %v624_v12 = vmul.f32 %v664_v3, %v623_v8 }
 0x339   :  { %v625_v15 = vadd.f32 %v664_v3, %v624_v12 }
 0x33b   :  { %v629_v18 = vsel %vm628_vm9, %v664_v3, %v625_v15 }
 0x33c   :  { %v634_v19 = vsel %vm631_vm10, %v633_v17, %v629_v18 }
 0x33d   :  { %v637_v21 = vmul.f32 0.3, %v634_v19 }
 0x33f   :  { %v638_v22 = vadd.f32 %v637_v21, %v636_v20 }
 0x341   :  { %640 = vst.msk [vmem:[%s794_s3] sm:$0xff] %vm639_vm11, %v638_v22 }
 0x342   :  { %645 = vsyncpa [#allocation3], 1 }
 0x343   :  { %646 = vsyncpa [#allocation5], 1 }

</bundles_post_ra>
